<compile_context>
chip_gen: v7x
topology: tpu7x:2x2x1
jax: 0.10.0
libtpu: 0.0.40
codegen_flags: <defaults>
</compile_context>

<pallas_src>
import functools

import numpy as np
import jax
import jax.numpy as jnp
from jax.experimental import pallas as pl
from jax.experimental.pallas import tpu as pltpu


_IGNORE = 255


def _vmem_limit_bytes(default=48 * 1024 * 1024):
    """Generation-aware scoped-VMEM limit: physical minus headroom, capped."""
    try:
        info = pltpu.get_tpu_info()
        phys = int(getattr(info, "vmem_capacity_bytes", 0) or 0)
    except Exception:
        phys = 0
    if phys <= 0:
        return default          # unknown generation: safe even for v7x (64 MiB)
    return int(min(96 * 1024 * 1024,
                   max(32 * 1024 * 1024, phys - 16 * 1024 * 1024)))


def _pick_tile(hw, cap):
    """Point-tile: multiple of 128, <= cap.  Prefers an exact divisor of hw
    (no padding copy); pads hw up to a tile multiple only when no decent
    divisor exists.  Never falls back to a full-HW (VMEM-busting) tile."""
    cap = max(128, (int(cap) // 128) * 128)
    hw128 = ((hw + 127) // 128) * 128
    if hw128 <= cap:
        return hw128                      # single (possibly padded) tile
    best = 0
    t = 128
    while t <= cap:
        if hw % t == 0:
            best = t
        t += 128
    if best >= min(512, cap):
        return best                       # exact divisor: no pad copy needed
    return cap                            # awkward hw: pad up to a cap multiple


def _pick_group(n_tiles, tn, target=8192):
    """Largest k dividing n_tiles with tn*k <= target (kernel-C super-tile)."""
    k = 1
    for cand in range(1, n_tiles + 1):
        if n_tiles % cand == 0 and tn * cand <= target:
            k = cand
    return k


def _proto_accum_kernel(f_ref, corine_ref, lucas_ref, sum_ref, cnt_ref):
    """Per-class feature sums / counts over lucas-valid points (one hw tile).

    f_ref:      (1, D, T)      features, native channel-major layout
    corine_ref: (1, 1, T)      raw (un-remapped) corine labels
    lucas_ref:  (1, 1, T)      lucas labels (255 = ignore)
    sum_ref:    (1, 1, D, CP)  per-class feature sums (accumulated over hw tiles)
    cnt_ref:    (1, 1, CP, 1)  per-class valid-point counts
    """
    @pl.when(pl.program_id(2) == 0)
    def _():
        sum_ref[...] = jnp.zeros_like(sum_ref)
        cnt_ref[...] = jnp.zeros_like(cnt_ref)

    feats = f_ref[0]                                        # (D, T)
    corine = corine_ref[0]                                  # (1, T)
    lucas = lucas_ref[0]                                    # (1, T)
    cp = cnt_ref.shape[2]
    t = corine.shape[1]

    class_idx = jax.lax.broadcasted_iota(jnp.int32, (cp, t), 0)
    hit = (class_idx == corine) & (lucas != _IGNORE)        # (CP, T) bool
    onehot = hit.astype(feats.dtype)

    # feats (D,T) x onehot (CP,T) contracting T -> (D, CP): any MXU operand
    # transpose falls on the tiny one-hot, never on the big feature tile.
    psum = jax.lax.dot_general(
        feats, onehot, dimension_numbers=(((1,), (1,)), ((), ())),
        preferred_element_type=jnp.float32)                 # (D, CP)
    sum_ref[0, 0] = sum_ref[0, 0] + psum
    cnt_ref[0, 0] = cnt_ref[0, 0] + jnp.sum(
        hit.astype(jnp.float32), axis=1, keepdims=True)


def _sim_kernel(p_ref, f_ref, corine_ref, sim_ref, ssq_ref):
    """prototypes @ features and per-class sum-of-squares over corine-valid pts.

    p_ref:      (CP, D)        row-normalized prototypes (padded rows = 0)
    f_ref:      (1, D, T)      features
    corine_ref: (1, 1, T)      raw corine labels
    sim_ref:    (1, CP, T)     masked similarity tile (written to HBM)
    ssq_ref:    (1, 1, CP, 1)  per-class sum of squares (accumulated over tiles)
    """
    @pl.when(pl.program_id(2) == 0)
    def _():
        ssq_ref[...] = jnp.zeros_like(ssq_ref)

    feats = f_ref[0]                                        # (D, T)
    protos = p_ref[...].astype(feats.dtype)                 # (CP, D)
    valid = (corine_ref[0] != _IGNORE).astype(jnp.float32)  # (1, T)

    sim = jnp.dot(protos, feats, preferred_element_type=jnp.float32)  # (CP, T)
    sim = sim * valid       # zeroed columns == torch's masked compaction
    sim_ref[0] = sim
    ssq_ref[0, 0] = ssq_ref[0, 0] + jnp.sum(sim * sim, axis=1, keepdims=True)


def _loss_kernel(sim_ref, corine_ref, inv_ref, tot_ref, cnt_ref, *, num_classes):
    """Row-normalize + softmax-style contrastive loss over one hw super-tile.

    sim_ref:    (1, CP, T)  masked similarities
    corine_ref: (1, 1, T)   raw corine labels
    inv_ref:    (CP, 1)     1 / (max(||row||, eps) * temperature)
    tot_ref:    (1, 1, 1)   sum of per-point losses (accumulated)
    cnt_ref:    (1, 1, 1)   number of corine-valid points (accumulated)
    """
    @pl.when(pl.program_id(1) == 0)
    def _():
        tot_ref[...] = jnp.zeros_like(tot_ref)
        cnt_ref[...] = jnp.zeros_like(cnt_ref)

    sim = sim_ref[0]                                        # (CP, T) f32
    lab = corine_ref[0]                                     # (1, T) i32
    inv = inv_ref[...]                                      # (CP, 1) f32

    cp, t = sim.shape
    valid = (lab != _IGNORE).astype(jnp.float32)            # (1, T)
    lab = jnp.where(lab == 7, 6, lab)                       # corine 7 -> 6 remap

    prot_feat = sim * inv                     # F.normalize(.., dim=-1) / temp
    class_idx = jax.lax.broadcasted_iota(jnp.int32, (cp, t), 0)

    # prot_feat[2] = (labels_corine_pts == 2)
    row2 = (lab == 2).astype(jnp.float32)
    prot_feat = jnp.where(class_idx == 2, row2, prot_feat)

    # log A2 = logsumexp over the real class rows (padded rows masked out)
    pf_m = jnp.where(class_idx < num_classes, prot_feat, -jnp.inf)
    m = jnp.max(pf_m, axis=0, keepdims=True)                # (1, T)
    log_a2 = m + jnp.log(jnp.sum(jnp.exp(pf_m - m), axis=0, keepdims=True))

    # log A1 = prot_feat[label_i, i], gathered via one-hot
    onehot = (class_idx == lab).astype(jnp.float32)
    log_a1 = jnp.sum(onehot * prot_feat, axis=0, keepdims=True)

    per_point = (log_a2 - log_a1) * valid                   # (1, T)
    tot_ref[0] = tot_ref[0] + jnp.sum(per_point, axis=1, keepdims=True)
    cnt_ref[0] = cnt_ref[0] + jnp.sum(valid, axis=1, keepdims=True)


class ContrastiveCrossViewLucasVSCorineLoss:
    """Functional JAX/Pallas port of the torch module's forward pass."""

    def __init__(self, num_classes=9, temperature=0.1, alpha=0.99,
                 feature_dim=768, tile_n=None, seed=0):
        self.num_classes = num_classes
        self.temperature = temperature
        self.alpha = alpha
        self.feature_dim = feature_dim
        self.tile_n = tile_n          # None -> auto (2048 on v7x, 4096 on v5e/v6e)
        # torch.rand((num_classes, feature_dim)) -> deterministic uniform [0, 1)
        self.prototypes = jax.random.uniform(
            jax.random.PRNGKey(seed), (num_classes, feature_dim),
            dtype=jnp.float32)

    def __call__(self, label, gt_lucas, features):
        b, d, h, w = features.shape
        c = self.num_classes
        cp = ((c + 7) // 8) * 8               # pad class dim to sublane multiple
        assert d == self.feature_dim
        hw = h * w

        # ---- generation-aware tile / VMEM budgets ---------------------------
        vmem_limit = _vmem_limit_bytes()
        itemsize = features.dtype.itemsize
        # kernel B dominates: double-buffered feature + sim + label blocks
        per_point = 2 * d * itemsize + 2 * cp * 4 + 4 * 4
        max_tn = max(128, (int(0.6 * vmem_limit) // per_point) // 128 * 128)
        if self.tile_n is None:
            cap_auto = 2048 if vmem_limit <= 48 * 1024 * 1024 else 4096
            tn_cap = min(cap_auto, max_tn)
        else:
            tn_cap = min(int(self.tile_n), max_tn)
        tn = _pick_tile(hw, tn_cap)
        hw_pad = -(-hw // tn) * tn
        pad = hw_pad - hw
        n_tiles = hw_pad // tn

        # v7x megacore: when batch alone cannot feed two TensorCores, split the
        # hw axis into a second 'parallel' chunk axis with per-chunk partials.
        nchunks = 1
        if b == 1 and n_tiles > 1:
            for f in (2, 3, 4):
                if n_tiles % f == 0:
                    nchunks = f
                    break
        spc = n_tiles // nchunks
        grid = (b, nchunks, spc)

        # ---- glue: downsample labels, keep features in native layout -------
        ds_c = label[:, ::4, ::4].reshape(b, 1, hw).astype(jnp.int32)
        ds_l = gt_lucas[:, ::4, ::4].reshape(b, 1, hw).astype(jnp.int32)
        feats = features.reshape(b, d, hw)    # free reshape, no relayout
        if pad:
            feats = jnp.pad(feats, ((0, 0), (0, 0), (0, pad)))
            ds_c = jnp.pad(ds_c, ((0, 0), (0, 0), (0, pad)),
                           constant_values=_IGNORE)
            ds_l = jnp.pad(ds_l, ((0, 0), (0, 0), (0, pad)),
                           constant_values=_IGNORE)
        # TODO(synk): if the producer already emits bf16 features they are used
        # as-is (halving HBM traffic); no standalone f32->bf16 cast is forced.

        cparams3 = pltpu.CompilerParams(
            dimension_semantics=("parallel", "parallel", "arbitrary"),
            vmem_limit_bytes=vmem_limit)

        feat_spec = pl.BlockSpec((1, d, tn),
                                 lambda i, ck, j: (i, 0, ck * spc + j))
        lab_spec = pl.BlockSpec((1, 1, tn),
                                lambda i, ck, j: (i, 0, ck * spc + j))

        # ---- kernel A: per-class sums/counts over lucas-valid points -------
        sums, counts = pl.pallas_call(
            _proto_accum_kernel,
            grid=grid,
            in_specs=[feat_spec, lab_spec, lab_spec],
            out_specs=(pl.BlockSpec((1, 1, d, cp), lambda i, ck, j: (i, ck, 0, 0)),
                       pl.BlockSpec((1, 1, cp, 1), lambda i, ck, j: (i, ck, 0, 0))),
            out_shape=(jax.ShapeDtypeStruct((b, nchunks, d, cp), jnp.float32),
                       jax.ShapeDtypeStruct((b, nchunks, cp, 1), jnp.float32)),
            compiler_params=cparams3,
        )(feats, ds_c, ds_l)
        sums_cd = jnp.sum(sums, axis=(0, 1)).T[:c]        # (C, D)
        counts = jnp.sum(counts, axis=(0, 1))[:c, 0]      # (C,)

        # ---- glue: vectorized EMA prototype update (rank-indexed as torch) -
        present = counts > 0
        ranks = jnp.cumsum(present.astype(jnp.int32)) - 1     # enumerate(unique)
        means = sums_cd / jnp.maximum(counts, 1.0)[:, None]   # (C, D)
        row_idx = jnp.arange(c)
        scatter = ((ranks[None, :] == row_idx[:, None]) &
                   present[None, :]).astype(jnp.float32)      # (C_row, C_cls)
        written = jnp.sum(scatter, axis=1, keepdims=True) > 0  # (C, 1)
        gathered = scatter @ means                             # (C, D)
        proto = jnp.where(
            written,
            self.alpha * gathered + (1.0 - self.alpha) * self.prototypes,
            self.prototypes)
        # TODO(synk): corine==255 at lucas-valid points would make the torch
        # reference index prototypes out of range; that edge case is not modeled.

        # self.prototypes = F.normalize(self.prototypes)
        pnorm = jnp.maximum(
            jnp.sqrt(jnp.sum(proto * proto, axis=1, keepdims=True)), 1e-12)
        proto = proto / pnorm
        self.prototypes = proto                 # persistent module state
        proto_p = jnp.zeros((cp, d), jnp.float32).at[:c].set(proto)

        # ---- kernel B: similarity slab + per-class sum of squares ----------
        sim, ssq = pl.pallas_call(
            _sim_kernel,
            grid=grid,
            in_specs=[pl.BlockSpec((cp, d), lambda i, ck, j: (0, 0)),
                      feat_spec, lab_spec],
            out_specs=(pl.BlockSpec((1, cp, tn),
                                    lambda i, ck, j: (i, 0, ck * spc + j)),
                       pl.BlockSpec((1, 1, cp, 1),
                                    lambda i, ck, j: (i, ck, 0, 0))),
            out_shape=(jax.ShapeDtypeStruct((b, cp, hw_pad), jnp.float32),
                       jax.ShapeDtypeStruct((b, nchunks, cp, 1), jnp.float32)),
            compiler_params=cparams3,
        )(proto_p, feats, ds_c)
        # TODO(synk): when B*CP*HW*4 fits the VMEM budget the sim slab could
        # stay resident in kernel B and the loss run as a pl.when epilogue,
        # removing this HBM round trip entirely (shape-dependent; not done).

        # F.normalize(sim, dim=-1) / temperature -> single per-class reciprocal
        row_norm = jnp.maximum(jnp.sqrt(jnp.sum(ssq, axis=(0, 1))), 1e-12)
        inv = (1.0 / (row_norm * self.temperature)).astype(jnp.float32)

        # ---- kernel C: contrastive loss, on its own (much larger) tile -----
        tn_c = tn * _pick_group(n_tiles, tn)
        grid_c = (b, hw_pad // tn_c)
        cparams2 = pltpu.CompilerParams(
            dimension_semantics=("parallel", "arbitrary"),
            vmem_limit_bytes=vmem_limit)
        tot, cnt = pl.pallas_call(
            functools.partial(_loss_kernel, num_classes=c),
            grid=grid_c,
            in_specs=[pl.BlockSpec((1, cp, tn_c), lambda i, j: (i, 0, j)),
                      pl.BlockSpec((1, 1, tn_c), lambda i, j: (i, 0, j)),
                      pl.BlockSpec((cp, 1), lambda i, j: (0, 0))],
            out_specs=(pl.BlockSpec((1, 1, 1), lambda i, j: (i, 0, 0)),
                       pl.BlockSpec((1, 1, 1), lambda i, j: (i, 0, 0))),
            out_shape=(jax.ShapeDtypeStruct((b, 1, 1), jnp.float32),
                       jax.ShapeDtypeStruct((b, 1, 1), jnp.float32)),
            compiler_params=cparams2,
        )(sim, ds_c, inv)

        total = jnp.sum(tot)
        count = jnp.sum(cnt)
        # guard against the degenerate zero-valid-point case (torch would NaN)
        return total / jnp.maximum(count, 1.0)


def _numpy_reference(prototypes, label, gt_lucas, features, num_classes,
                     temperature, alpha):
    """Direct translation of the torch forward (dynamic-shape, host-side)."""
    P = np.array(prototypes, dtype=np.float32, copy=True)
    ds_c = label[:, ::4, ::4]
    ds_l = gt_lucas[:, ::4, ::4]
    mc = ds_c != 255
    ml = ds_l != 255
    lab_c = ds_c[mc].copy()
    lab_l = ds_c[ml].copy()
    lab_c[lab_c == 7] = 6
    fperm = np.transpose(features, (0, 2, 3, 1))
    fc = fperm[mc]
    fl = fperm[ml]
    for idx, cls in enumerate(np.unique(lab_l)):
        P[idx] = alpha * fl[lab_l == cls].mean(axis=0) + (1 - alpha) * P[idx]
    P = P / np.maximum(np.linalg.norm(P, axis=1, keepdims=True), 1e-12)
    pf = P @ fc.T
    pf = pf / np.maximum(np.linalg.norm(pf, axis=1, keepdims=True), 1e-12)
    pf = pf / temperature
    pf[2] = (lab_c == 2).astype(pf.dtype)
    E = np.exp(pf)
    A1 = E[lab_c, np.arange(len(lab_c))]
    A2 = E.sum(axis=0)
    return float(np.mean(-np.log(A1 / A2)))


if __name__ == "__main__":
    NUM_CLASSES = 9

    def make_inputs(key, B, D, H, W):
        k1, k2, k3, k4, k5 = jax.random.split(key, 5)
        features = jax.random.normal(k1, (B, D, H, W), dtype=jnp.float32)
        corine = jax.random.randint(k2, (B, 4 * H, 4 * W), 0, NUM_CLASSES,
                                    dtype=jnp.int32)
        corine = jnp.where(jax.random.uniform(k3, corine.shape) < 0.2, 255,
                           corine)
        lucas = jax.random.randint(k4, (B, 4 * H, 4 * W), 0, NUM_CLASSES,
                                   dtype=jnp.int32)
        lucas = jnp.where(jax.random.uniform(k5, lucas.shape) < 0.7, 255, lucas)
        # keep lucas-valid points a subset of corine-valid points (see TODO)
        lucas = jnp.where(corine == 255, 255, lucas)
        return features, corine, lucas

    # case 1: multi-batch, hw a tile multiple (exercises accumulation over hw)
    # case 2: batch=1 (exercises the extra 'parallel' hw-chunk axis) and
    #         hw = 288 (exercises the pad-to-tile path)
    cases = [dict(B=2, D=32, H=16, W=16, tile_n=128),
             dict(B=1, D=32, H=18, W=16, tile_n=128)]

    key = jax.random.PRNGKey(0)
    for idx, cfg in enumerate(cases):
        key, sub = jax.random.split(key)
        features, corine, lucas = make_inputs(sub, cfg["B"], cfg["D"],
                                              cfg["H"], cfg["W"])
        loss_mod = ContrastiveCrossViewLucasVSCorineLoss(
            num_classes=NUM_CLASSES, temperature=0.1, alpha=0.99,
            feature_dim=cfg["D"], tile_n=cfg["tile_n"], seed=0)

        protos0 = np.asarray(loss_mod.prototypes)   # capture pre-EMA state
        loss = jax.block_until_ready(loss_mod(corine, lucas, features))

        ref = _numpy_reference(protos0, np.asarray(corine), np.asarray(lucas),
                               np.asarray(features), NUM_CLASSES, 0.1, 0.99)

        assert np.isfinite(float(loss)), (idx, float(loss))
        assert abs(float(loss) - ref) <= 2e-3 * max(1.0, abs(ref)), \
            (idx, float(loss), ref)

    print("KERNEL_OK")
</pallas_src>

<mosaic_0001>
module attributes {stable_mosaic.version = 11 : i64} {
  func.func @_proto_accum_kernel(%arg0: i32, %arg1: i32, %arg2: i32, %arg3: memref<1x32x128xf32, #tpu.memory_space<vmem>>, %arg4: memref<1x1x128xi32, #tpu.memory_space<vmem>>, %arg5: memref<1x1x128xi32, #tpu.memory_space<vmem>>, %arg6: memref<1x1x32x16xf32, #tpu.memory_space<vmem>>, %arg7: memref<1x1x16x1xf32, #tpu.memory_space<vmem>>) attributes {dimension_semantics = [#tpu.dimension_semantics<parallel>, #tpu.dimension_semantics<parallel>, #tpu.dimension_semantics<arbitrary>], iteration_bounds = array<i64: 2, 1, 2>, scalar_prefetch = 0 : i64, scratch_operands = 0 : i64, tpu.core_type = #tpu.core_type<tc>, window_params = [{transform_indices = @transform_0, window_bounds = array<i64: 1, 32, 128>}, {transform_indices = @transform_1, window_bounds = array<i64: 1, 1, 128>}, {transform_indices = @transform_2, window_bounds = array<i64: 1, 1, 128>}, {transform_indices = @transform_3, window_bounds = array<i64: 1, 1, 32, 16>}, {transform_indices = @transform_4, window_bounds = array<i64: 1, 1, 16, 1>}]} {
    %c0_i32 = arith.constant 0 : i32
    %0 = arith.cmpi eq, %arg2, %c0_i32 : i32
    %1 = arith.extui %0 : i1 to i32
    %c0_i32_0 = arith.constant 0 : i32
    %2 = arith.cmpi ne, %1, %c0_i32_0 : i32
    scf.if %2 {
      %cst_26 = arith.constant 0.000000e+00 : f32
      %35 = vector.broadcast %cst_26 : f32 to vector<1x1x32x16xf32>
      %c0_27 = arith.constant 0 : index
      %c0_28 = arith.constant 0 : index
      %c0_29 = arith.constant 0 : index
      %c0_30 = arith.constant 0 : index
      %36 = vector.load %arg6[%c0_27, %c0_28, %c0_29, %c0_30] : memref<1x1x32x16xf32, #tpu.memory_space<vmem>>, vector<1x1x32x16xf32>
      tpu.vector_store %arg6[%c0_27, %c0_28, %c0_29, %c0_30], %35 {strides = array<i32>} : memref<1x1x32x16xf32, #tpu.memory_space<vmem>>, vector<1x1x32x16xf32>,
      %cst_31 = arith.constant 0.000000e+00 : f32
      %37 = vector.broadcast %cst_31 : f32 to vector<1x1x16x1xf32>
      %c0_32 = arith.constant 0 : index
      %c0_33 = arith.constant 0 : index
      %c0_34 = arith.constant 0 : index
      %c0_35 = arith.constant 0 : index
      %38 = vector.load %arg7[%c0_32, %c0_33, %c0_34, %c0_35] : memref<1x1x16x1xf32, #tpu.memory_space<vmem>>, vector<1x1x16x1xf32>
      tpu.vector_store %arg7[%c0_32, %c0_33, %c0_34, %c0_35], %37 {strides = array<i32>} : memref<1x1x16x1xf32, #tpu.memory_space<vmem>>, vector<1x1x16x1xf32>,
    } else {
    }
    %c0 = arith.constant 0 : index
    %c0_1 = arith.constant 0 : index
    %c0_2 = arith.constant 0 : index
    %3 = vector.load %arg3[%c0, %c0_1, %c0_2] : memref<1x32x128xf32, #tpu.memory_space<vmem>>, vector<1x32x128xf32>
    %4 = vector.shape_cast %3 : vector<1x32x128xf32> to vector<32x128xf32>
    %c0_3 = arith.constant 0 : index
    %c0_4 = arith.constant 0 : index
    %c0_5 = arith.constant 0 : index
    %5 = vector.load %arg4[%c0_3, %c0_4, %c0_5] : memref<1x1x128xi32, #tpu.memory_space<vmem>>, vector<1x1x128xi32>
    %6 = vector.shape_cast %5 : vector<1x1x128xi32> to vector<1x128xi32>
    %c0_6 = arith.constant 0 : index
    %c0_7 = arith.constant 0 : index
    %c0_8 = arith.constant 0 : index
    %7 = vector.load %arg5[%c0_6, %c0_7, %c0_8] : memref<1x1x128xi32, #tpu.memory_space<vmem>>, vector<1x1x128xi32>
    %8 = vector.shape_cast %7 : vector<1x1x128xi32> to vector<1x128xi32>
    %9 = tpu.iota {dimensions = array<i32: 0>} : vector<16x128xi32>
    %10 = vector.broadcast %6 : vector<1x128xi32> to vector<16x128xi32>
    %11 = arith.cmpi eq, %9, %10 : vector<16x128xi32>
    %c255_i32 = arith.constant 255 : i32
    %12 = vector.broadcast %c255_i32 : i32 to vector<1x128xi32>
    %13 = arith.cmpi ne, %8, %12 : vector<1x128xi32>
    %14 = vector.broadcast %13 : vector<1x128xi1> to vector<16x128xi1>
    %15 = arith.andi %11, %14 : vector<16x128xi1>
    %16 = arith.extui %15 : vector<16x128xi1> to vector<16x128xi32>
    %17 = arith.sitofp %16 : vector<16x128xi32> to vector<16x128xf32>
    %cst = arith.constant dense<0.000000e+00> : vector<32x16xf32>
    %18 = tpu.matmul %4, %17, %cst {dimension_numbers = #tpu.dot_dimension_numbers<[1], [1], [0], [0], [0, 0, 1, 0], [], []>} : vector<32x128xf32>, vector<16x128xf32>, vector<32x16xf32> -> vector<32x16xf32>
    %c0_9 = arith.constant 0 : index
    %c0_10 = arith.constant 0 : index
    %c0_11 = arith.constant 0 : index
    %c0_12 = arith.constant 0 : index
    %19 = vector.load %arg6[%c0_9, %c0_10, %c0_11, %c0_12] : memref<1x1x32x16xf32, #tpu.memory_space<vmem>>, vector<1x1x32x16xf32>
    %20 = vector.shape_cast %19 : vector<1x1x32x16xf32> to vector<32x16xf32>
    %21 = arith.addf %20, %18 : vector<32x16xf32>
    %c0_13 = arith.constant 0 : index
    %c0_14 = arith.constant 0 : index
    %c0_15 = arith.constant 0 : index
    %c0_16 = arith.constant 0 : index
    %22 = vector.load %arg6[%c0_13, %c0_14, %c0_15, %c0_16] : memref<1x1x32x16xf32, #tpu.memory_space<vmem>>, vector<1x1x32x16xf32>
    %23 = vector.shape_cast %22 : vector<1x1x32x16xf32> to vector<32x16xf32>
    %24 = vector.shape_cast %21 : vector<32x16xf32> to vector<1x1x32x16xf32>
    tpu.vector_store %arg6[%c0_13, %c0_14, %c0_15, %c0_16], %24 {strides = array<i32>} : memref<1x1x32x16xf32, #tpu.memory_space<vmem>>, vector<1x1x32x16xf32>,
    %c0_17 = arith.constant 0 : index
    %c0_18 = arith.constant 0 : index
    %c0_19 = arith.constant 0 : index
    %c0_20 = arith.constant 0 : index
    %25 = vector.load %arg7[%c0_17, %c0_18, %c0_19, %c0_20] : memref<1x1x16x1xf32, #tpu.memory_space<vmem>>, vector<1x1x16x1xf32>
    %26 = vector.shape_cast %25 : vector<1x1x16x1xf32> to vector<16x1xf32>
    %27 = arith.extui %15 : vector<16x128xi1> to vector<16x128xi32>
    %28 = arith.sitofp %27 : vector<16x128xi32> to vector<16x128xf32>
    %cst_21 = arith.constant dense<0.000000e+00> : vector<16xf32>
    %29 = vector.multi_reduction <add>, %28, %cst_21 [1] : vector<16x128xf32> to vector<16xf32>
    %30 = vector.shape_cast %29 : vector<16xf32> to vector<16x1xf32>
    %31 = arith.addf %26, %30 : vector<16x1xf32>
    %c0_22 = arith.constant 0 : index
    %c0_23 = arith.constant 0 : index
    %c0_24 = arith.constant 0 : index
    %c0_25 = arith.constant 0 : index
    %32 = vector.load %arg7[%c0_22, %c0_23, %c0_24, %c0_25] : memref<1x1x16x1xf32, #tpu.memory_space<vmem>>, vector<1x1x16x1xf32>
    %33 = vector.shape_cast %32 : vector<1x1x16x1xf32> to vector<16x1xf32>
    %34 = vector.shape_cast %31 : vector<16x1xf32> to vector<1x1x16x1xf32>
    tpu.vector_store %arg7[%c0_22, %c0_23, %c0_24, %c0_25], %34 {strides = array<i32>} : memref<1x1x16x1xf32, #tpu.memory_space<vmem>>, vector<1x1x16x1xf32>,
    return
  }
  func.func @transform_0(%arg0: i32, %arg1: i32, %arg2: i32) -> (i32, i32, i32) {
    %c2_i32 = arith.constant 2 : i32
    %0 = arith.muli %arg1, %c2_i32 : i32
    %1 = arith.addi %0, %arg2 : i32
    %c0_i32 = arith.constant 0 : i32
    %c0_i32_0 = arith.constant 0 : i32
    return %arg0, %c0_i32, %1 : i32, i32, i32
  }
  func.func @transform_1(%arg0: i32, %arg1: i32, %arg2: i32) -> (i32, i32, i32) {
    %c2_i32 = arith.constant 2 : i32
    %0 = arith.muli %arg1, %c2_i32 : i32
    %1 = arith.addi %0, %arg2 : i32
    %c0_i32 = arith.constant 0 : i32
    %c0_i32_0 = arith.constant 0 : i32
    return %arg0, %c0_i32, %1 : i32, i32, i32
  }
  func.func @transform_2(%arg0: i32, %arg1: i32, %arg2: i32) -> (i32, i32, i32) {
    %c2_i32 = arith.constant 2 : i32
    %0 = arith.muli %arg1, %c2_i32 : i32
    %1 = arith.addi %0, %arg2 : i32
    %c0_i32 = arith.constant 0 : i32
    %c0_i32_0 = arith.constant 0 : i32
    return %arg0, %c0_i32, %1 : i32, i32, i32
  }
  func.func @transform_3(%arg0: i32, %arg1: i32, %arg2: i32) -> (i32, i32, i32, i32) {
    %c0_i32 = arith.constant 0 : i32
    %c0_i32_0 = arith.constant 0 : i32
    %c0_i32_1 = arith.constant 0 : i32
    return %arg0, %arg1, %c0_i32, %c0_i32_0 : i32, i32, i32, i32
  }
  func.func @transform_4(%arg0: i32, %arg1: i32, %arg2: i32) -> (i32, i32, i32, i32) {
    %c0_i32 = arith.constant 0 : i32
    %c0_i32_0 = arith.constant 0 : i32
    %c0_i32_1 = arith.constant 0 : i32
    return %arg0, %arg1, %c0_i32, %c0_i32_0 : i32, i32, i32, i32
  }
}

</mosaic_0001>

<bundles_post_ra>
// kernel: tpu_custom_call.1
= control target key start
LH: loop header
LB: loop body
LE: loop exit
PB: predicated region body
PF: predicated region fallthrough
CT: control target
= control target key end

     0   :  { %s1249_s0 = inlined_call_operand.hbm [shape: f32[2,32,256], index: 0, kind: input, shape index: {}]   ;;  %s1250_s1 = inlined_call_operand.hbm [shape: s32[2,1,256], index: 1, kind: input, shape index: {}]   ;;  %s1251_s2 = inlined_call_operand.vmem [shape: s32[2,1,256], index: 2, kind: input, shape index: {}]   ;;  %s1252_s3 = inlined_call_operand.vmem [shape: f32[2,1,32,16], index: 3, kind: output, shape index: {0}]   ;;  %s1253_s4 = inlined_call_operand.vmem [shape: f32[2,1,16,1], index: 4, kind: output, shape index: {1}]  }
   0x1   :  { %1256 = sst [smem:[#allocation9_spill]] %s1249_s0 }
   0x2   :  { %10 = vsyncpa [#allocation3], 0 }
   0x3   :  { %12 = vsyncpa [#allocation3 + $0x1], 0 }
   0x4   :  { %13 = vsyncpa [#allocation5], 0 }
   0x5   :  { %15 = vsyncpa [#allocation5 + $0x1], 0  ;;  %s1012_s15 = smov 0   ;;  %s1014_s16 = smov 0  }
   0x6   :  { %s1016_s17 = smov 0   ;;  %s1018_s18 = smov 0  }
   0x7   :  { %s1020_s19 = smov 0   ;;  %s1022_s20 = smov 0  }
   0x8   :  { %s1024_s21 = smov 0   ;;  %s1026_s22 = smov 0  }
   0x9 LB: > { %s715_s23 = sadd.s32 4294967295, %s976_s22   ;;  %s33_s24 = sadd.s32 1, %s968_s20  ;;  %s976_s22 = sphi %s1026_s22, %s21_s22   ;;  %s972_s21 = sphi %s1024_s21, %s1273_s21   ;;  %s968_s20 = sphi %s1022_s20, %s1272_s20   ;;  %s964_s19 = sphi %s1020_s19, %s1271_s19   ;;  %s960_s18 = sphi %s1018_s18, %s1270_s18   ;;  %s956_s17 = sphi %s1016_s17, %s1269_s17   ;;  %s952_s16 = sphi %s1014_s16, %s1268_s16   ;;  %s948_s15 = sphi %s1012_s15, %s1267_s15  }
   0xa   : > { %p34_p0 = scmp.ge.s32.totalorder %s33_s24, 2  ;;  %s40_s25 = sadd.s32 1, %s972_s21 }
   0xb   : > { %s53_s26 = sadd.s32 1, %s956_s17  ;;  %p60_p1 = scmp.ne.s32.totalorder %s956_s17, %s952_s16 }
   0xc   : > { %s1275_s24 = smov (%p34_p0, %s33_s24), 0  ;;  %s1277_s25 = smov (!%p34_p0, %s40_s25), %s972_s21 }
   0xd   : > { %s49_s27 = ssub.s32 %s968_s20, %s1275_s24  ;;  %p61_p2 = scmp.eq.s32.totalorder %s976_s22, 0 }
   0xe   : > { %p42_p3 = scmp.ge.s32.totalorder %s1277_s25, 2  ;;  %p66_p4 = scmp.ne.s32.totalorder %s952_s16, %s948_s15 }
   0xf   : > { %p1063_p5 = por %p61_p2, %p60_p1  ;;  %p67_p6 = scmp.eq.s32.totalorder %s715_s23, 0 }
  0x10   : > { %s1279_s25 = smov (%p42_p3, %s1277_s25), 0  ;;  %p774_p8 = scmp.lt.s32.totalorder %s976_s22, 4 }
  0x11   : > { %1258 = sst [smem:[#allocation8_spill]] %s1279_s25  ;;  %p1069_p7 = por %p67_p6, %p66_p4 }
  0x12   : > { %s48_s30 = ssub.s32 %s972_s21, %s1279_s25  ;;  %s1077_s6 = sand.u32 1, %s956_s17  }
  0x13   : > { %s1259_s29 = scalar_select %p1069_p7, 1, 0 }
  0x14   : > { %s50_s5 = sor.u32 %s49_s27, %s48_s30  ;;  %s719_s7 = sshll.u32 %s1077_s6, 5 }
  0x15   : > { %p51_p9 = scmp.eq.s32.totalorder %s50_s5, 0  ;;  %s720_s8 = sshll.u32 %s972_s21, 3 }
  0x16   : > { %s221_s10 = sadd.s32 %s968_s20, %s720_s8  ;;  %s214_s12 = scalar_lea.vmem [#allocation2], %s719_s7 }
  0x17   : > { %s1082_s9 = scalar_select %p51_p9, %s956_s17, %s53_s26  }
  0x18   : > { %s721_s11 = sshll.u32 %s221_s10, 7  ;;  %s224_s13 = sshll.u32 %s214_s12, 4  ;;  %s1090_s13 = int_to_ptr.vmem [resolvable:$true] %s224_s13 }
  0x19   : > { %s1260_s0 = sld [smem:[#allocation9_spill]]  ;;  %p1096_p10 = pnand %p774_p8, %p1063_p5 }
  0x1a   : > { %s211_s27 = scalar_lea.sflag [#allocation3], %s1077_s6 }
  0x1b   : > { %p848_p13 = pneg %p1096_p10 }
  0x1f   : > { %s1088_s23 = scalar_lea.hbm %s1260_s0, %s721_s11  ;;  %s851_s28 = scalar_lea.hbm %s1260_s0, 2048 }
  0x20   : > { %s846_s30 = scalar_lea.hbm %s1088_s23, 512  ;;  %p852_p2 = scmp.lt.u32.totalorder %s1088_s23, %s1260_s0 }
  0x21   : > { %p847_p12 = scmp.ne.s32.totalorder %s1088_s23, %s846_s30  ;;  %p853_p3 = scmp.lt.u32.totalorder %s851_s28, %s846_s30 }
  0x22   : > { %p855_p5 = scmp.lt.u32.totalorder %s846_s30, %s1088_s23 }
  0x23   : > { %p849_p0 = pnand %p848_p13, %p847_p12  ;;  %p854_p4 = por %p853_p3, %p852_p2 }
  0x25   : > { %p850_p1 = pneg %p849_p0  ;;  %p856_p6 = por %p855_p5, %p854_p4 }
  0x27   : > { %p857_p8 = pnand %p856_p6, %p850_p1 }
  0x29   : > { %860 = shalt.err (!%p857_p8)
}
  0x2a   : > { %s861_s11 = scalar_lea.vmem %s1090_s13, 512  ;;  %s978_s12 = smov [#allocation2]  }
  0x2b   : > { %p862_p9 = scmp.ne.s32.totalorder %s1090_s13, %s861_s11  ;;  %s866_s14 = sshll.u32 %s978_s12, 4  ;;  %s867_s14 = int_to_ptr.vmem [resolvable:$false] %s866_s14 }
  0x2c   : > { %s868_s15 = scalar_lea.vmem %s867_s14, 1024  ;;  %p869_p11 = scmp.lt.s32.totalorder %s1090_s13, %s867_s14 }
  0x2d   : > { %p864_p12 = pnand %p862_p9, %p848_p13  ;;  %p870_p2 = scmp.lt.s32.totalorder %s868_s15, %s861_s11 }
  0x2f   : > { %p865_p0 = pneg %p864_p12  ;;  %p871_p3 = por %p870_p2, %p869_p11 }
  0x31   : > { %p872_p4 = pnand %p871_p3, %p865_p0 }
  0x33   : > { %875 = shalt.err (!%p872_p4)
}
  0x34   : > { %s979_s30 = smov 256   ;;  %s980_s5 = smov 128  }
  0x35   : > { %s981_s7 = smov 8   ;;  %p267_p11 = scmp.lt.s32.totalorder %s976_s22, 5 }
  0x36   : > { %770 = dma.hbm_to_vmem [thread:$0]  (!%p1096_p10), %s1088_s23, 512, %s1090_s13, %s211_s27, %s979_s30, %s980_s5, %s981_s7  }
  0x37   : > { %s722_s28 = sshll.u32 %s972_s21, 1  ;;  %p1262_p1 = scmp.ge.s32.totalorder %s976_s22, 1 }
  0x38   : > { %s244_s10 = sadd.s32 %s968_s20, %s722_s28  ;;  %s237_s12 = scalar_lea.vmem [#allocation4], %s1077_s6 }
  0x39   : > { %p1133_p5 = pnand %p1262_p1, %p267_p11  ;;  %s723_s11 = sshll.u32 %s244_s10, 4 }
  0x3a   : > { %s248_s14 = sshll.u32 %s237_s12, 4  ;;  %s1142_s25 = scalar_lea.hbm %s1250_s1, %s723_s11  ;;  %s249_s14 = int_to_ptr.vmem [resolvable:$true] %s248_s14 }
  0x3b   : > { %s1263_s8 = scalar_select %p1133_p5, 1, 0 }
  0x3c   : > { %s235_s13 = scalar_lea.sflag [#allocation5], %s1077_s6  ;;  %s876_s23 = scalar_lea.hbm %s1142_s25, 16 }
  0x3d   : > { %p877_p6 = scmp.ne.s32.totalorder %s1142_s25, %s876_s23  ;;  %s881_s5 = scalar_lea.hbm %s1250_s1, 64 }
  0x3e   : > { %p882_p12 = scmp.lt.u32.totalorder %s1142_s25, %s1250_s1  ;;  %p883_p0 = scmp.lt.u32.totalorder %s881_s5, %s876_s23 }
  0x3f   : > { %p879_p8 = pnand %p877_p6, %p848_p13  ;;  %p885_p3 = scmp.lt.u32.totalorder %s876_s23, %s1142_s25 }
  0x40   : > { %p884_p2 = por %p883_p0, %p882_p12 }
  0x41   : > { %p880_p9 = pneg %p879_p8 }
  0x42   : > { %p886_p4 = por %p885_p3, %p884_p2 }
  0x44   : > { %p887_p11 = pnand %p886_p4, %p880_p9 }
  0x46   : > { %890 = shalt.err (!%p887_p11)
}
  0x47   : > { %s891_s6 = scalar_lea.vmem %s249_s14, 16  ;;  %s982_s28 = smov [#allocation4]  }
  0x48   : > { %p892_p1 = scmp.ne.s32.totalorder %s249_s14, %s891_s6  ;;  %s896_s10 = sshll.u32 %s982_s28, 4  ;;  %s897_s10 = int_to_ptr.vmem [resolvable:$false] %s896_s10 }
  0x49   : > { %s898_s11 = scalar_lea.vmem %s897_s10, 32  ;;  %p899_p7 = scmp.lt.s32.totalorder %s249_s14, %s897_s10 }
  0x4a   : > { %p894_p6 = pnand %p892_p1, %p848_p13  ;;  %p900_p5 = scmp.lt.s32.totalorder %s898_s11, %s891_s6 }
  0x4c   : > { %p895_p8 = pneg %p894_p6  ;;  %p901_p0 = por %p900_p5, %p899_p7 }
  0x4e   : > { %p902_p12 = pnand %p901_p0, %p895_p8 }
  0x50   : > { %905 = shalt.err (!%p902_p12)
}
  0x51   : > { %773 = dma.hbm_to_vmem [thread:$0]  (!%p1096_p10), %s1142_s25, 16, %s249_s14, %s235_s13  }
  0x52   : > { %p1264_p9 = scmp.ne.s32.totalorder %s1263_s8, 0 }
  0x53   : > { %s1167_s12 = sand.u32 (!%p1264_p9), 1, %s952_s16   ;;  %p1265_p7 = scmp.ne.s32.totalorder (!%p1264_p9), %s1259_s29, 0 }
  0x54   : > { %271 = sbr.rel (%p1264_p9) target bundleno = 344 (0x158), region = 32  ;;  %s725_s15 = sshll.u32 (!%p1264_p9), %s1167_s12, 5 }
  0x55   : > { %s274_s23 = scalar_lea.sflag (!%p1264_p9), [#allocation3], %s1167_s12  ;;  %s1171_s27 = scalar_lea.vmem (!%p1264_p9), [#allocation2], %s725_s15 }
  0x5b   : > { %939 = dma.done.wait (%p1265_p7), %s274_s23, 512  }
  0x5c   : > { %941 = vsyncadd (%p1265_p7), %s274_s23, 4294966784  ;;  %s283_s25 = scalar_lea.sflag [#allocation5], %s1167_s12  ;;  %s285_s26 = scalar_lea.vmem [#allocation4], %s1167_s12 }
  0x5d   : > { %943 = dma.done.wait (%p1265_p7), %s283_s25, 16  }
  0x5e   : > { %945 = vsyncadd (%p1265_p7), %s283_s25, 4294967280  ;;  %p342_p10 = scmp.lt.s32.totalorder %s964_s19, 1  ;;  %p344_p13 = scmp.lt.s32.totalorder %s960_s18, 1 }
  0x5f   : > { %p731_p5 = scmp.ne.s32.totalorder %s960_s18, 0 }
  0x60   : > { %s1281_s19 = smov (!%p342_p10, %s964_s19), 1  ;;  %vm373_vm0 = vcmask (!%p731_p5), 130048   ;;  %vm378_vm1 = vcmask (!%p731_p5), 7168   ;;  %v983_v0 = vmov (!%p731_p5), 0.0  }
  0x61   : > { %s345_s8 = scalar_select %p344_p13, %s960_s18, 1 }
  0x62   : > { %s726_s14 = sshll.u32 %s1281_s19, 1  ;;  %s739_s13 = sshll.u32 %s1281_s19, 5 }
  0x63   : > { %s347_s30 = sadd.s32 %s726_s14, %s345_s8  ;;  %s1190_s0 = scalar_lea.vmem %s1252_s3, %s739_s13 }
  0x64   : > { %s348_s29 = scalar_lea.vmem %s1251_s2, %s347_s30  ;;  %s740_s10 = sshll.u32 %s1281_s19, 4  ;;  %374 = vst.msk [vmem:[%s1190_s0] sm:$0xff] (!%p731_p5), %vm373_vm0, %v983_v0  ;;  %375 = vst.msk [vmem:[%s1190_s0 + $0x8] sm:$0xff] (!%p731_p5), %vm373_vm0, %v983_v0 }
  0x65   : > { %s1198_s23 = scalar_lea.vmem %s1253_s4, %s740_s10  ;;  %372 = sbr.rel (%p731_p5) target bundleno = 108 (0x6c), region = 44  ;;  %376 = vst.msk [vmem:[%s1190_s0 + $0x10] sm:$0xff] (!%p731_p5), %vm373_vm0, %v983_v0  ;;  %377 = vst.msk [vmem:[%s1190_s0 + $0x18] sm:$0xff] (!%p731_p5), %vm373_vm0, %v983_v0 }
  0x66   : > { %379 = vst.msk [vmem:[%s1198_s23] sm:$0xff] (!%p731_p5), %vm378_vm1, %v983_v0  ;;  %380 = vst.msk [vmem:[%s1198_s23 + $0x8] sm:$0xff] (!%p731_p5), %vm378_vm1, %v983_v0 }
  0x6c PF: > { %v386_v1 = vld [vmem:[%s348_s29] sm:$0x1]  ;;  %v387_v2 = vlaneseq  ;;  %v383_v4 = vld [vmem:[%s1171_s27 + $0x10] sm:$0xff]  ;;  %v984_v7 = vmov 0   ;;  %v985_v12 = vmov 0.0   ;;  %v382_v16 = vld [vmem:[%s1171_s27 + $0x8] sm:$0xff] }
  0x6d   : > { %v381_v3 = vld [vmem:[%s1171_s27] sm:$0xff]  ;;  %vm396_vm2 = vcmp.ne.s32.totalorder %v386_v1, 255  ;;  %754 = vmatprep.mubr.f32.mxu1 %v383_v4  ;;  %v986_v14 = vmov 1.0|1.0   ;;  %v384_v17 = vld [vmem:[%s1171_s27 + $0x18] sm:$0xff]  ;;  %vm515_vm9 = vcmask 7168  }
  0x6e   : > { %751 = vmatprep.mubr.f32.mxu0 %v381_v3  ;;  %v388_v5 = vshrl.u32 %v387_v2, 7  ;;  %v732_v6 = vld [vmem:[%s285_s26] ss:$0 sm:$0xff]  ;;  %v397_v8 = vsel %vm396_vm2, 1, %v984_v7  ;;  %v508_v21 = vld [vmem:[%s1198_s23 + $0x8] sm:$0xff]  ;;  %v497_v25 = vld [vmem:[%s1190_s0 + $0x18] sm:$0xff] }
  0x6f   : > { %v507_v18 = vld [vmem:[%s1198_s23] sm:$0xff]  ;;  %v495_v24 = vld [vmem:[%s1190_s0 + $0x8] sm:$0xff]  ;;  %v496_v27 = vld [vmem:[%s1190_s0 + $0x10] sm:$0xff]  ;;  %vm502_vm10 = vcmask 130048  }
  0x70   : > { %v389_v9 = vadd.s32 8, %v388_v5  ;;  %v400_v10 = vsub.s32 0, %v388_v5  ;;  %vm394_vm3 = vcmp.eq.s32.totalorder %v388_v5, %v732_v6  ;;  %v494_v26 = vld [vmem:[%s1190_s0] sm:$0xff] }
  0x72   : > { %v401_v11 = vrot.slane %v397_v8, %v400_v10  ;;  %vm395_vm4 = vcmp.eq.s32.totalorder %v389_v9, %v732_v6 }
  0x74   : > { %vm402_vm5 = vcmp.eq.s32.totalorder %v401_v11, 1 }
  0x75   : > { %vm403_vm6 = vmand %vm394_vm3, %vm402_vm5 }
  0x76   : > { %vm404_vm7 = vmand %vm395_vm4, %vm402_vm5  ;;  %v733_v13 = vsel %vm403_vm6, 1.0, %v985_v12 }
  0x77   : > { %vm757_vm8 = vmpackc.low %vm404_vm7, %vm403_vm6  ;;  %509 = vadd.xlane.f32.xlu0 %v733_v13  ;;  %v734_v15 = vsel %vm404_vm7, 1.0, %v985_v12 }
  0x78   : > { %758 = vmatprep.subr.msk.bf16.mxu0 %vm757_vm8, %v986_v14  ;;  %761 = vmatprep.subr.msk.bf16.mxu1 %vm757_vm8, %v986_v14 }
  0x79   : > { %760 = vmatpush3.bf16.xpose.msk.msra.mxu0 %vm757_vm8, %v986_v14  ;;  %762 = vmatpush3.bf16.xpose.msk.msra.mxu1 %vm757_vm8, %v986_v14 }
  0x7b   : > { %511 = vadd.xlane.f32.xlu0 %v734_v15 }
  0x80   : > { %752 = vmatmul.mubr.f32.vlgmr.msra.gmra.mrb[0].mxu0 %v382_v16  ;;  %755 = vmatmul.mubr.f32.vlgmr.msra.gmra.mrb[0].mxu1 %v384_v17 }
 0x104   : > { %v510_v19 = vpop.xlane.xlu0 %509 }
 0x105   : > { %v513_v20 = vadd.f32 %v510_v19, %v507_v18 }
 0x107   : > { %516 = vst.msk [vmem:[%s1198_s23] sm:$0xff] %vm515_vm9, %v513_v20 }
 0x108   : > { %v512_v22 = vpop.xlane.xlu0 %511 }
 0x109   : > { %v514_v23 = vadd.f32 %v512_v22, %v508_v21 }
 0x10b   : > { %517 = vst.msk [vmem:[%s1198_s23 + $0x8] sm:$0xff] %vm515_vm9, %v514_v23 }
 0x153   : > { %v753_v28 = vpop.f32.mrb[0].mxu0  ;;  %v756_v29 = vpop.f32.mrb[0].mxu1 }
 0x154   : > { %v499_v30 = vadd.f32 %v753_v28, %v495_v24  ;;  %v501_v31 = vadd.f32 %v756_v29, %v497_v25  ;;  %v475_v32 = vpop.f32.mrb[1].mxu0  ;;  %v485_v33 = vpop.f32.mrb[1].mxu1 }
 0x155   : > { %v498_v34 = vadd.f32 %v494_v26, %v475_v32  ;;  %v500_v35 = vadd.f32 %v496_v27, %v485_v33 }
 0x156   : > { %504 = vst.msk [vmem:[%s1190_s0 + $0x8] sm:$0xff] %vm502_vm10, %v499_v30  ;;  %506 = vst.msk [vmem:[%s1190_s0 + $0x18] sm:$0xff] %vm502_vm10, %v501_v31 }
 0x157   : > { %503 = vst.msk [vmem:[%s1190_s0] sm:$0xff] %vm502_vm10, %v498_v34  ;;  %505 = vst.msk [vmem:[%s1190_s0 + $0x10] sm:$0xff] %vm502_vm10, %v500_v35 }
 0x158 PF: > { %s21_s22 = sadd.s32 1, %s976_s22   ;;  %s1266_s12 = sld [smem:[#allocation8_spill]] }
 0x159   : > { %p18_p2 = scmp.ge.s32.totalorder %s21_s22, 6   ;;  %s1267_s15 = smov %s952_s16 }
 0x15a   : > { %s1268_s16 = smov %s956_s17  ;;  %s1269_s17 = smov %s1082_s9 }
 0x15b   : > { %s1270_s18 = smov %s968_s20  ;;  %s1271_s19 = smov %s972_s21 }
 0x15c   : > { %s1272_s20 = smov %s1275_s24  ;;  %20 = sbr.rel (!%p18_p2) target bundleno = 9 (0x9), region = 104 }
 0x15e   : > { %s1273_s21 = smov %s1266_s12 }
 0x163   :  { %571 = vsyncpa [#allocation3], 1 }
 0x164   :  { %573 = vsyncpa [#allocation3 + $0x1], 1 }
 0x165   :  { %574 = vsyncpa [#allocation5], 1 }
 0x166   :  { %576 = vsyncpa [#allocation5 + $0x1], 1 }

</bundles_post_ra>
